<compile_context>
chip_gen: v5e
topology: v5e:2x2
jax: 0.10.0
libtpu: 0.0.40
codegen_flags: <defaults>
</compile_context>

<pallas_src>
import jax
import jax.numpy as jnp
from jax.experimental import pallas as pl
from jax.experimental.pallas import tpu as pltpu

# ---------------- configuration (small, deterministic) ----------------
S = 8           # sequence length
B = 2           # batch size
H = 32          # hidden size
E = 4           # number of experts (gate output dim)
INIT_LAMBDA = 0.2


# ---------------- Pallas kernel: Linear gate over a tile of tokens ----------------
def _depth1_gate_kernel(x_ref,      # (TILE_N, H) token tile
                        w_ref,      # (H, E)      pre-transposed weight (resident)
                        b_ref,      # (1, E)      bias (resident, f32)
                        out_ref):   # (TILE_N, E) gate logits
    x = x_ref[...]
    w = w_ref[...]
    # MXU matmul with f32 accumulation; bias add / cast stay in f32 (v5e-safe).
    logits = jnp.dot(x, w, preferred_element_type=jnp.float32) + b_ref[...]
    out_ref[...] = logits.astype(out_ref.dtype)


def depth1_gate_forward(hidden_states, weight, bias, *, tile_n=512):
    """hidden_states: (..., H); weight: (E, H) PyTorch layout; bias: (E,).

    Returns gate logits of shape (..., E), identical to nn.Linear(H, E)(x).
    """
    h = hidden_states.shape[-1]
    e = weight.shape[0]
    lead = hidden_states.shape[:-1]

    x2d = hidden_states.reshape(-1, h)       # flatten all leading dims -> (N, H)
    n = x2d.shape[0]

    # Layout plumbing outside the kernel is free: transpose the static weight
    # once to (H, E) so the kernel's RHS is already in matmul-friendly layout.
    w_he = jnp.transpose(weight)              # (H, E)
    b2d = bias.reshape(1, e).astype(jnp.float32)

    # --- token tiling -------------------------------------------------------
    # TILE_N must be a multiple of 8 (f32 sublane).  Default 512 rows (v6e
    # measurement: ~85% of HBM roofline vs ~29% at 128); clamp for tiny N.
    # On v7x re-derive against the 64 MiB VMEM: 2x(TILE_N*H*dt) in-buffers +
    # 2x(TILE_N*E*4) out-buffers must fit with headroom.
    n_ceil8 = ((n + 7) // 8) * 8
    tile = max(8, min(int(tile_n), n_ceil8))
    tile = (tile // 8) * 8
    n_pad = pl.cdiv(n, tile) * tile
    if n_pad != n:
        x2d = jnp.pad(x2d, ((0, n_pad - n), (0, 0)))
    grid = (n_pad // tile,)

    out_dtype = hidden_states.dtype
    itm_in = jnp.dtype(x2d.dtype).itemsize
    itm_out = jnp.dtype(out_dtype).itemsize
    cost = pl.CostEstimate(
        flops=2 * n_pad * h * e,
        transcendentals=0,
        bytes_accessed=n_pad * h * itm_in + h * e * itm_in + n_pad * e * itm_out,
    )

    out = pl.pallas_call(
        _depth1_gate_kernel,
        out_shape=jax.ShapeDtypeStruct((n_pad, e), out_dtype),
        grid=grid,
        in_specs=[
            # Token tile: streamed / double-buffered over the grid.
            pl.BlockSpec((tile, h), lambda i: (i, 0)),
            # Weight + bias: constant index_map -> stay resident in VMEM.
            pl.BlockSpec((h, e), lambda i: (0, 0)),
            pl.BlockSpec((1, e), lambda i: (0, 0)),
        ],
        out_specs=pl.BlockSpec((tile, e), lambda i: (i, 0)),
        compiler_params=pltpu.CompilerParams(
            # Pure data-parallel token axis: shard across TCs on megacore chips.
            dimension_semantics=("parallel",),
        ),
        cost_estimate=cost,
    )(x2d, w_he, b2d)

    if n_pad != n:
        out = out[:n]
    return out.reshape(*lead, e)


# ---------------- setup glue (mirrors __init__ / init_weight) ----------------
def build_params(key):
    kw, _ = jax.random.split(key)
    # init_weight(init_lambda): normal(std=0.01) weight, constant(init_lambda) bias
    weight = 0.01 * jax.random.normal(kw, (E, H), jnp.float32)   # PyTorch (out, in)
    bias = jnp.full((E,), INIT_LAMBDA, jnp.float32)
    return weight, bias


# ---------------- pure-JAX reference (mirrors the PyTorch forward) ----------------
def reference_forward(hidden_states, weight, bias):
    return jnp.einsum('sbh,eh->sbe', hidden_states, weight) + bias


if __name__ == "__main__":
    key = jax.random.PRNGKey(0)
    kx, kp = jax.random.split(key)
    x = jax.random.normal(kx, (S, B, H), jnp.float32)   # hidden_states (seq, batch, hidden)
    weight, bias = build_params(kp)

    out = depth1_gate_forward(x, weight, bias)
    out = jax.block_until_ready(out)

    ref = reference_forward(x, weight, bias)
    assert out.shape == (S, B, E), out.shape
    assert jnp.allclose(out, ref, rtol=1e-5, atol=1e-5), float(jnp.max(jnp.abs(out - ref)))
    print("KERNEL_OK")
</pallas_src>

<mosaic_0001>
module attributes {stable_mosaic.version = 11 : i64} {
  func.func @_depth1_gate_kernel(%arg0: i32, %arg1: memref<16x32xf32, #tpu.memory_space<vmem>>, %arg2: memref<32x4xf32, #tpu.memory_space<vmem>>, %arg3: memref<1x4xf32, #tpu.memory_space<vmem>>, %arg4: memref<16x4xf32, #tpu.memory_space<vmem>>) attributes {dimension_semantics = [#tpu.dimension_semantics<parallel>], iteration_bounds = array<i64: 1>, scalar_prefetch = 0 : i64, scratch_operands = 0 : i64, tpu.core_type = #tpu.core_type<tc>, window_params = [{transform_indices = @transform_0, window_bounds = array<i64: 16, 32>}, {pipeline_mode = #tpu.pipeline_mode<synchronous>, transform_indices = @transform_1, window_bounds = array<i64: 32, 4>}, {pipeline_mode = #tpu.pipeline_mode<synchronous>, transform_indices = @transform_2, window_bounds = array<i64: 1, 4>}, {transform_indices = @transform_3, window_bounds = array<i64: 16, 4>}]} {
    %c0 = arith.constant 0 : index
    %c0_0 = arith.constant 0 : index
    %0 = vector.load %arg1[%c0, %c0_0] : memref<16x32xf32, #tpu.memory_space<vmem>>, vector<16x32xf32>
    %c0_1 = arith.constant 0 : index
    %c0_2 = arith.constant 0 : index
    %1 = vector.load %arg2[%c0_1, %c0_2] : memref<32x4xf32, #tpu.memory_space<vmem>>, vector<32x4xf32>
    %cst = arith.constant dense<0.000000e+00> : vector<16x4xf32>
    %2 = tpu.matmul %0, %1, %cst {dimension_numbers = #tpu.dot_dimension_numbers<[1], [0], [0], [1], [0, 0, 1, 1], [], []>} : vector<16x32xf32>, vector<32x4xf32>, vector<16x4xf32> -> vector<16x4xf32>
    %c0_3 = arith.constant 0 : index
    %c0_4 = arith.constant 0 : index
    %3 = vector.load %arg3[%c0_3, %c0_4] : memref<1x4xf32, #tpu.memory_space<vmem>>, vector<1x4xf32>
    %4 = vector.broadcast %3 : vector<1x4xf32> to vector<16x4xf32>
    %5 = arith.addf %2, %4 : vector<16x4xf32>
    %c0_5 = arith.constant 0 : index
    %c0_6 = arith.constant 0 : index
    %6 = vector.load %arg4[%c0_5, %c0_6] : memref<16x4xf32, #tpu.memory_space<vmem>>, vector<16x4xf32>
    tpu.vector_store %arg4[%c0_5, %c0_6], %5 {strides = array<i32>} : memref<16x4xf32, #tpu.memory_space<vmem>>, vector<16x4xf32>,
    return
  }
  func.func @transform_0(%arg0: i32) -> (i32, i32) {
    %c0_i32 = arith.constant 0 : i32
    %c0_i32_0 = arith.constant 0 : i32
    return %arg0, %c0_i32 : i32, i32
  }
  func.func @transform_1(%arg0: i32) -> (i32, i32) {
    %c0_i32 = arith.constant 0 : i32
    %c0_i32_0 = arith.constant 0 : i32
    %c0_i32_1 = arith.constant 0 : i32
    return %c0_i32, %c0_i32_0 : i32, i32
  }
  func.func @transform_2(%arg0: i32) -> (i32, i32) {
    %c0_i32 = arith.constant 0 : i32
    %c0_i32_0 = arith.constant 0 : i32
    %c0_i32_1 = arith.constant 0 : i32
    return %c0_i32, %c0_i32_0 : i32, i32
  }
  func.func @transform_3(%arg0: i32) -> (i32, i32) {
    %c0_i32 = arith.constant 0 : i32
    %c0_i32_0 = arith.constant 0 : i32
    return %arg0, %c0_i32 : i32, i32
  }
}

</mosaic_0001>

<bundles_post_ra>
// kernel: tpu_custom_call.1
= control target key start
LH: loop header
LB: loop body
LE: loop exit
PB: predicated region body
PF: predicated region fallthrough
CT: control target
= control target key end

     0   :  { %vm24_vm0 = vcmask 261120   ;;  %vm54_vm1 = vcmask 31744   ;;  %s115_s1 = inlined_call_operand.vmem [shape: f32[32,4], index: 1, kind: input, shape index: {}]   ;;  %s116_s2 = inlined_call_operand.vmem [shape: f32[1,4], index: 2, kind: input, shape index: {}]   ;;  %s117_s0 = inlined_call_operand.vmem [shape: f32[16,32], index: 0, kind: input, shape index: {}]   ;;  %s118_s3 = inlined_call_operand.vmem [shape: f32[16,4], index: 3, kind: output, shape index: {}]  }
   0x1   :  { %v19_v0 = vld [vmem:[%s115_s1 + $0x18] sm:$0xff]  ;;  %v18_v1 = vld [vmem:[%s115_s1 + $0x10] sm:$0xff]  ;;  %v17_v2 = vld [vmem:[%s115_s1 + $0x8] sm:$0xff] }
   0x2   :  { %43 = vmatpush.msra.mxu0 %v19_v0  ;;  %63 = vmatpush.msra.mxu1 %v19_v0  ;;  %v16_v3 = vld [vmem:[%s115_s1] sm:$0xff]  ;;  %v15_v5 = vld [vmem:[%s117_s0 + $0x8] sm:$0xff] }
   0x3   :  { %v14_v4 = vld [vmem:[%s117_s0] sm:$0xff] }
   0x4   :  { %44 = vmatpush.msra.mxu0 %v18_v1  ;;  %64 = vmatpush.msra.mxu1 %v18_v1  ;;  %v67_v6 = vld [vmem:[%s116_s2] ss:$0 sm:$0xff] }
   0x6   :  { %45 = vmatpush.msra.mxu0 %v17_v2  ;;  %65 = vmatpush.msra.mxu1 %v17_v2 }
   0x8   :  { %46 = vmatpush.msra.mxu0 %v16_v3  ;;  %66 = vmatpush.msra.mxu1 %v16_v3 }
   0x9   :  { %61 = vmatmul.msk.f32.vlgmr.msra.gmra.mxu0 %vm24_vm0, %v14_v4  ;;  %62 = vmatmul.msk.f32.vlgmr.msra.gmra.mxu1 %vm24_vm0, %v15_v5 }
  0x86   :  { %v48_v7 = vpop.f32.mrf.mxu0  ;;  %v51_v8 = vpop.f32.mrf.mxu1 }
  0x87   :  { %v49_v9 = vadd.f32 %v67_v6, %v48_v7  ;;  %v52_v10 = vadd.f32 %v67_v6, %v51_v8 }
  0x89   :  { %55 = vst.msk [vmem:[%s118_s3] sm:$0xff] %vm54_vm1, %v49_v9 }
  0x8a   :  { %56 = vst.msk [vmem:[%s118_s3 + $0x8] sm:$0xff] %vm54_vm1, %v52_v10 }

</bundles_post_ra>
